<compile_context>
chip_gen: v6e
topology: v6e:2x2x1
jax: 0.10.0
libtpu: 0.0.40
codegen_flags: <defaults>
</compile_context>

<pallas_src>
import functools

import jax
import jax.numpy as jnp
from jax.experimental import pallas as pl
from jax.experimental.pallas import tpu as pltpu

NEG_SLOPE = 0.2      # GATv2Conv default negative_slope
TILE_I = 128         # dst-node tile (sublane axis of the score block)
TILE_J = 128         # src-node tile (lane axis of the score block)
MASK_VAL = -1e30     # f32 sentinel for masked scores


def _pad_to(v, m):
    return ((v + m - 1) // m) * m


# ----------------------------------------------------------------------------
# Kernel 1: node projections  h_l = x @ W_l + b_l ,  h_r = x @ W_r + b_r
# ----------------------------------------------------------------------------
def _proj_kernel(x_ref, wl_ref, wr_ref, b_ref, ol_ref, or_ref):
    xb = x_ref[...]
    ol_ref[...] = (jnp.dot(xb, wl_ref[...], preferred_element_type=jnp.float32)
                   + b_ref[0:1, :])
    or_ref[...] = (jnp.dot(xb, wr_ref[...], preferred_element_type=jnp.float32)
                   + b_ref[1:2, :])


def gat_proj(x, w_l, w_r, b):
    n_pad, f_pad = x.shape
    c = w_l.shape[1]
    tp = 256 if n_pad % 256 == 0 else 128      # bigger row tile on v6e/v7x-sized inputs
    grid = (n_pad // tp,)
    out_sd = jax.ShapeDtypeStruct((n_pad, c), jnp.float32)
    return pl.pallas_call(
        _proj_kernel,
        out_shape=(out_sd, out_sd),
        grid_spec=pltpu.PrefetchScalarGridSpec(
            num_scalar_prefetch=0,
            grid=grid,
            in_specs=[
                pl.BlockSpec((tp, f_pad), lambda i: (i, 0)),
                pl.BlockSpec((f_pad, c), lambda i: (0, 0)),
                pl.BlockSpec((f_pad, c), lambda i: (0, 0)),
                pl.BlockSpec((2, c), lambda i: (0, 0)),
            ],
            out_specs=(pl.BlockSpec((tp, c), lambda i: (i, 0)),
                       pl.BlockSpec((tp, c), lambda i: (i, 0))),
        ),
        compiler_params=pltpu.CompilerParams(
            dimension_semantics=("parallel",)),
    )(x, w_l, w_r, b)


# ----------------------------------------------------------------------------
# Kernel 2: GATv2 attention + aggregation, online masked softmax, block-sparse
#   grid = (n_pad // TILE_I  [dst, parallel],  n_pad // TILE_J  [src, arbitrary])
#   pvec rows: 0 = W_edge (lin_edge), 1 = att, 2 = output bias
# ----------------------------------------------------------------------------
def _gatv2_attn_kernel(bm_ref, hr_ref, hlt_ref, hl_ref, adj_ref, ea_ref, pvec_ref,
                       o_ref, m_sc, l_sc, acc_sc, *, apply_relu):
    i = pl.program_id(0)
    j = pl.program_id(1)
    nj = pl.num_programs(1)
    ti, tj = adj_ref.shape
    c = hr_ref.shape[1]

    @pl.when(j == 0)
    def _init():
        m_sc[...] = jnp.full_like(m_sc, MASK_VAL)
        l_sc[...] = jnp.zeros_like(l_sc)
        acc_sc[...] = jnp.zeros_like(acc_sc)

    # Skip all-masked adjacency blocks entirely (mathematical no-op).
    @pl.when(bm_ref[i * nj + j] > 0)
    def _compute():
        h_dst = hr_ref[...]                      # (TI, c)  lin_r(x)[dst tile]
        h_srcT = hlt_ref[...]                    # (c, TJ)  lin_l(x)[src tile]^T
        mask = adj_ref[...] > 0                  # (TI, TJ) from int8 {0,1}
        ea = ea_ref[...]                         # (TI, TJ) scalar edge attr
        we_row = pvec_ref[0:1, :]                # (1, c)   lin_edge weight
        att_row = pvec_ref[1:2, :]               # (1, c)   attention vector

        # GATv2 score, one channel at a time -> every slab is a dense (TI, TJ) tile:
        #   score[i,j] = sum_c att[c] * leaky(h_r[i,c] + h_l[j,c] + ea[i,j]*we[c])
        score = jnp.zeros((ti, tj), jnp.float32)
        for ch in range(c):                      # static unroll (c = 32 or 16)
            comb = (h_dst[:, ch:ch + 1] + h_srcT[ch:ch + 1, :]
                    + ea * we_row[:, ch:ch + 1])
            comb = jnp.maximum(comb, NEG_SLOPE * comb)          # leaky_relu
            score = score + att_row[:, ch:ch + 1] * comb
        score = jnp.where(mask, score, MASK_VAL)

        # online (flash-style) masked softmax + aggregation
        m_prev = m_sc[...]                                       # (TI, 1)
        m_new = jnp.maximum(m_prev, jnp.max(score, axis=1, keepdims=True))
        corr = jnp.exp(m_prev - m_new)
        p = jnp.where(mask, jnp.exp(score - m_new), 0.0)         # (TI, TJ)
        l_sc[...] = corr * l_sc[...] + jnp.sum(p, axis=1, keepdims=True)
        j_off = pl.multiple_of(j * tj, tj)
        h_src = hl_ref[pl.ds(j_off, tj), :]      # (TJ, c) slice of resident lin_l slab
        acc_sc[...] = corr * acc_sc[...] + jnp.dot(
            p, h_src, preferred_element_type=jnp.float32)        # MXU aggregation
        m_sc[...] = m_new

    @pl.when(j == nj - 1)
    def _finalize():
        bias = pvec_ref[2:3, :]                  # (1, c) output bias
        denom = l_sc[...]
        inv = pl.reciprocal(jnp.where(denom > 0.0, denom, 1.0), approx=True)
        out = acc_sc[...] * inv + bias
        if apply_relu:
            out = jnp.maximum(out, 0.0)
        o_ref[...] = out.astype(o_ref.dtype)


def gat_attn(block_mask, h_r, h_lT, h_l, adj, ea, pvec, apply_relu):
    n_pad = adj.shape[0]
    c = h_r.shape[1]
    ti, tj = TILE_I, TILE_J
    grid = (n_pad // ti, n_pad // tj)
    kern = functools.partial(_gatv2_attn_kernel, apply_relu=apply_relu)

    flops = (6 * c + 8) * n_pad * n_pad + 2 * n_pad * n_pad * c
    bytes_acc = (adj.size * adj.dtype.itemsize          # adjacency (int8)
                 + ea.size * ea.dtype.itemsize          # edge attrs (f32)
                 + 3 * n_pad * c * 4                    # h_r + h_lT + resident h_l
                 + n_pad * c * 4)                       # output
    cost = pl.CostEstimate(flops=int(flops),
                           transcendentals=int(n_pad * n_pad + n_pad),
                           bytes_accessed=int(bytes_acc))

    vmem_limit = min(64 * 1024 * 1024, 16 * 1024 * 1024 + 2 * n_pad * c * 4)

    return pl.pallas_call(
        kern,
        out_shape=jax.ShapeDtypeStruct((n_pad, c), jnp.float32),
        grid_spec=pltpu.PrefetchScalarGridSpec(
            num_scalar_prefetch=1,                       # block bitmap -> SMEM
            grid=grid,
            in_specs=[
                pl.BlockSpec((ti, c), lambda i, j, bm: (i, 0)),      # h_r  (dst)
                pl.BlockSpec((c, tj), lambda i, j, bm: (0, j)),      # h_l^T (src, score)
                pl.BlockSpec((n_pad, c), lambda i, j, bm: (0, 0)),   # h_l  resident (agg)
                pl.BlockSpec((ti, tj), lambda i, j, bm: (i, j)),     # adj  (int8)
                pl.BlockSpec((ti, tj), lambda i, j, bm: (i, j)),     # edge attr (f32)
                pl.BlockSpec((8, c), lambda i, j, bm: (0, 0)),       # packed params
            ],
            out_specs=pl.BlockSpec((ti, c), lambda i, j, bm: (i, 0)),
            scratch_shapes=[
                pltpu.VMEM((ti, 1), jnp.float32),        # running max
                pltpu.VMEM((ti, 1), jnp.float32),        # running denom
                pltpu.VMEM((ti, c), jnp.float32),        # accumulator
            ],
        ),
        compiler_params=pltpu.CompilerParams(
            dimension_semantics=("parallel", "arbitrary"),
            vmem_limit_bytes=int(vmem_limit)),
        cost_estimate=cost,
    )(block_mask, h_r, h_lT, h_l, adj, ea, pvec)


# ----------------------------------------------------------------------------
# Glue: densify edge list, block bitmap, deterministic params, encoder forward
# ----------------------------------------------------------------------------
def densify_edges(edge_index, edge_attr, n_pad):
    src, dst = edge_index[0], edge_index[1]
    adj = jnp.zeros((n_pad, n_pad), jnp.int8).at[dst, src].set(1)
    ea = jnp.zeros((n_pad, n_pad), jnp.float32).at[dst, src].set(edge_attr[:, 0])
    return adj, ea


def block_bitmap(adj, ti, tj):
    n_pad = adj.shape[0]
    n_bi, n_bj = n_pad // ti, n_pad // tj
    blk = adj.reshape(n_bi, ti, n_bj, tj)
    return jnp.any(blk != 0, axis=(1, 3)).astype(jnp.int32).reshape(-1)


def _glorot(key, shape):
    fan_in, fan_out = shape[0], shape[-1]
    limit = (6.0 / (fan_in + fan_out)) ** 0.5
    return jax.random.uniform(key, shape, jnp.float32, -limit, limit)


def init_gatv2_params(key, c_in, c_out):
    f_pad = _pad_to(c_in, 8)
    ks = jax.random.split(key, 4)
    w_l = jnp.zeros((f_pad, c_out), jnp.float32).at[:c_in].set(_glorot(ks[0], (c_in, c_out)))
    w_r = jnp.zeros((f_pad, c_out), jnp.float32).at[:c_in].set(_glorot(ks[1], (c_in, c_out)))
    b = jnp.zeros((2, c_out), jnp.float32)               # lin_l / lin_r biases (zero init)
    pvec = jnp.zeros((8, c_out), jnp.float32)
    pvec = pvec.at[0].set(_glorot(ks[2], (1, c_out))[0])  # row 0: W_edge (lin_edge, no bias)
    pvec = pvec.at[1].set(_glorot(ks[3], (1, c_out))[0])  # row 1: att vector
    # row 2: output bias (zero init)
    return {"w_l": w_l, "w_r": w_r, "b": b, "pvec": pvec}


def init_gat_encoder(key, in_channels, hidden_channels, out_channels, num_layers):
    keys = jax.random.split(key, num_layers)
    params, c_in = [], in_channels
    for i in range(num_layers - 1):
        params.append(init_gatv2_params(keys[i], c_in, hidden_channels))
        c_in = hidden_channels
    params.append(init_gatv2_params(keys[-1], c_in, out_channels))
    return params


def gat_encoder_forward(params, x, edge_index, edge_attr, final_activation,
                        out_channels):
    n, f_in = x.shape
    n_pad = _pad_to(max(n, TILE_J), TILE_J)
    f_pad = _pad_to(f_in, 8)

    adj, ea = densify_edges(edge_index, edge_attr, n_pad)
    bm = block_bitmap(adj, TILE_I, TILE_J)
    h = jnp.zeros((n_pad, f_pad), jnp.float32).at[:n, :f_in].set(x)

    num_layers = len(params)
    for li, p in enumerate(params):
        relu = (li < num_layers - 1) or final_activation
        h_l, h_r = gat_proj(h, p["w_l"], p["w_r"], p["b"])
        h_lT = jnp.transpose(h_l)                  # (c, n_pad): tiny XLA transpose
        h = gat_attn(bm, h_r, h_lT, h_l, adj, ea, p["pvec"], apply_relu=relu)
    return h[:n, :out_channels]


if __name__ == "__main__":
    key = jax.random.PRNGKey(0)
    k_x, k_attr, k_params = jax.random.split(key, 3)

    num_nodes = 16
    in_channels = 4
    hidden_channels = 32
    out_channels = 16
    num_layers = 3
    final_activation = True

    # node features
    x = jax.random.normal(k_x, (num_nodes, in_channels), jnp.float32)

    # deterministic bidirectional ring graph: E = 2 * N edges
    idx = jnp.arange(num_nodes)
    src = jnp.concatenate([idx, (idx + 1) % num_nodes])
    dst = jnp.concatenate([(idx + 1) % num_nodes, idx])
    edge_index = jnp.stack([src, dst]).astype(jnp.int32)          # (2, 32)
    edge_attr = jax.random.normal(k_attr, (edge_index.shape[1], 1), jnp.float32)

    params = init_gat_encoder(k_params, in_channels, hidden_channels,
                              out_channels, num_layers)

    out = gat_encoder_forward(params, x, edge_index, edge_attr,
                              final_activation, out_channels)
    out = jax.block_until_ready(out)
    assert out.shape == (num_nodes, out_channels)
    assert bool(jnp.all(jnp.isfinite(out)))
    print("KERNEL_OK")
</pallas_src>

<mosaic_0001>
module attributes {stable_mosaic.version = 11 : i64} {
  func.func @_proj_kernel(%arg0: i32, %arg1: memref<128x8xf32, #tpu.memory_space<vmem>>, %arg2: memref<8x32xf32, #tpu.memory_space<vmem>>, %arg3: memref<8x32xf32, #tpu.memory_space<vmem>>, %arg4: memref<2x32xf32, #tpu.memory_space<vmem>>, %arg5: memref<128x32xf32, #tpu.memory_space<vmem>>, %arg6: memref<128x32xf32, #tpu.memory_space<vmem>>) attributes {dimension_semantics = [#tpu.dimension_semantics<parallel>], iteration_bounds = array<i64: 1>, scalar_prefetch = 0 : i64, scratch_operands = 0 : i64, tpu.core_type = #tpu.core_type<tc>, window_params = [{transform_indices = @transform_0, window_bounds = array<i64: 128, 8>}, {pipeline_mode = #tpu.pipeline_mode<synchronous>, transform_indices = @transform_1, window_bounds = array<i64: 8, 32>}, {pipeline_mode = #tpu.pipeline_mode<synchronous>, transform_indices = @transform_2, window_bounds = array<i64: 8, 32>}, {pipeline_mode = #tpu.pipeline_mode<synchronous>, transform_indices = @transform_3, window_bounds = array<i64: 2, 32>}, {transform_indices = @transform_4, window_bounds = array<i64: 128, 32>}, {transform_indices = @transform_5, window_bounds = array<i64: 128, 32>}]} {
    %c0 = arith.constant 0 : index
    %c0_0 = arith.constant 0 : index
    %0 = vector.load %arg1[%c0, %c0_0] : memref<128x8xf32, #tpu.memory_space<vmem>>, vector<128x8xf32>
    %c0_1 = arith.constant 0 : index
    %c0_2 = arith.constant 0 : index
    %1 = vector.load %arg2[%c0_1, %c0_2] : memref<8x32xf32, #tpu.memory_space<vmem>>, vector<8x32xf32>
    %cst = arith.constant dense<0.000000e+00> : vector<128x32xf32>
    %2 = tpu.matmul %0, %1, %cst {dimension_numbers = #tpu.dot_dimension_numbers<[1], [0], [0], [1], [0, 0, 1, 1], [], []>} : vector<128x8xf32>, vector<8x32xf32>, vector<128x32xf32> -> vector<128x32xf32>
    %c0_3 = arith.constant 0 : index
    %c0_4 = arith.constant 0 : index
    %3 = vector.load %arg4[%c0_3, %c0_4] : memref<2x32xf32, #tpu.memory_space<vmem>>, vector<1x32xf32>
    %4 = vector.broadcast %3 : vector<1x32xf32> to vector<128x32xf32>
    %5 = arith.addf %2, %4 : vector<128x32xf32>
    %c0_5 = arith.constant 0 : index
    %c0_6 = arith.constant 0 : index
    %6 = vector.load %arg5[%c0_5, %c0_6] : memref<128x32xf32, #tpu.memory_space<vmem>>, vector<128x32xf32>
    tpu.vector_store %arg5[%c0_5, %c0_6], %5 {strides = array<i32>} : memref<128x32xf32, #tpu.memory_space<vmem>>, vector<128x32xf32>,
    %c0_7 = arith.constant 0 : index
    %c0_8 = arith.constant 0 : index
    %7 = vector.load %arg3[%c0_7, %c0_8] : memref<8x32xf32, #tpu.memory_space<vmem>>, vector<8x32xf32>
    %cst_9 = arith.constant dense<0.000000e+00> : vector<128x32xf32>
    %8 = tpu.matmul %0, %7, %cst_9 {dimension_numbers = #tpu.dot_dimension_numbers<[1], [0], [0], [1], [0, 0, 1, 1], [], []>} : vector<128x8xf32>, vector<8x32xf32>, vector<128x32xf32> -> vector<128x32xf32>
    %c1 = arith.constant 1 : index
    %c0_10 = arith.constant 0 : index
    %9 = vector.load %arg4[%c1, %c0_10] : memref<2x32xf32, #tpu.memory_space<vmem>>, vector<1x32xf32>
    %10 = vector.broadcast %9 : vector<1x32xf32> to vector<128x32xf32>
    %11 = arith.addf %8, %10 : vector<128x32xf32>
    %c0_11 = arith.constant 0 : index
    %c0_12 = arith.constant 0 : index
    %12 = vector.load %arg6[%c0_11, %c0_12] : memref<128x32xf32, #tpu.memory_space<vmem>>, vector<128x32xf32>
    tpu.vector_store %arg6[%c0_11, %c0_12], %11 {strides = array<i32>} : memref<128x32xf32, #tpu.memory_space<vmem>>, vector<128x32xf32>,
    return
  }
  func.func @transform_0(%arg0: i32) -> (i32, i32) {
    %c0_i32 = arith.constant 0 : i32
    %c0_i32_0 = arith.constant 0 : i32
    return %arg0, %c0_i32 : i32, i32
  }
  func.func @transform_1(%arg0: i32) -> (i32, i32) {
    %c0_i32 = arith.constant 0 : i32
    %c0_i32_0 = arith.constant 0 : i32
    %c0_i32_1 = arith.constant 0 : i32
    return %c0_i32, %c0_i32_0 : i32, i32
  }
  func.func @transform_2(%arg0: i32) -> (i32, i32) {
    %c0_i32 = arith.constant 0 : i32
    %c0_i32_0 = arith.constant 0 : i32
    %c0_i32_1 = arith.constant 0 : i32
    return %c0_i32, %c0_i32_0 : i32, i32
  }
  func.func @transform_3(%arg0: i32) -> (i32, i32) {
    %c0_i32 = arith.constant 0 : i32
    %c0_i32_0 = arith.constant 0 : i32
    %c0_i32_1 = arith.constant 0 : i32
    return %c0_i32, %c0_i32_0 : i32, i32
  }
  func.func @transform_4(%arg0: i32) -> (i32, i32) {
    %c0_i32 = arith.constant 0 : i32
    %c0_i32_0 = arith.constant 0 : i32
    return %arg0, %c0_i32 : i32, i32
  }
  func.func @transform_5(%arg0: i32) -> (i32, i32) {
    %c0_i32 = arith.constant 0 : i32
    %c0_i32_0 = arith.constant 0 : i32
    return %arg0, %c0_i32 : i32, i32
  }
}

</mosaic_0001>

<bundles_post_ra>
// kernel: tpu_custom_call.1
= control target key start
LH: loop header
LB: loop body
LE: loop exit
PB: predicated region body
PF: predicated region fallthrough
CT: control target
= control target key end

     0   :  { %vm41_vm0 = vcmask 64512   ;;  %vm235_vm1 = vcmask 261120   ;;  %s833_s1 = inlined_call_operand.vmem [shape: f32[8,32], index: 1, kind: input, shape index: {}]   ;;  %s834_s2 = inlined_call_operand.vmem [shape: f32[8,32], index: 2, kind: input, shape index: {}]   ;;  %s835_s0 = inlined_call_operand.vmem [shape: f32[128,8], index: 0, kind: input, shape index: {}]   ;;  %s836_s3 = inlined_call_operand.vmem [shape: f32[2,32], index: 3, kind: input, shape index: {}]   ;;  %s837_s4 = inlined_call_operand.vmem [shape: f32[128,32], index: 4, kind: output, shape index: {0}]   ;;  %s838_s5 = inlined_call_operand.vmem [shape: f32[128,32], index: 5, kind: output, shape index: {1}]  }
   0x1   :  { %v35_v0 = vld [vmem:[%s833_s1] sm:$0xff]  ;;  %v20_v3 = vld [vmem:[%s835_s0 + $0x8] sm:$0xff]  ;;  %v21_v4 = vld [vmem:[%s835_s0 + $0x10] sm:$0xff] }
   0x2   :  { %v252_v1 = vld [vmem:[%s834_s2] sm:$0xff]  ;;  %495 = vmatprep.subr.mxu0 %v35_v0  ;;  %v22_v5 = vld [vmem:[%s835_s0 + $0x18] sm:$0xff]  ;;  %v24_v7 = vld [vmem:[%s835_s0 + $0x28] sm:$0xff] }
   0x3   :  { %v19_v2 = vld [vmem:[%s835_s0] sm:$0xff]  ;;  %521 = vmatprep.subr.mxu1 %v252_v1  ;;  %496 = vmatpush3.msra.mxu0 %v35_v0  ;;  %v25_v8 = vld [vmem:[%s835_s0 + $0x30] sm:$0xff]  ;;  %v26_v9 = vld [vmem:[%s835_s0 + $0x38] sm:$0xff] }
   0x4   :  { %497 = vmatprep.mubr.msk.f32.mxu0 %vm41_vm0, %v19_v2  ;;  %522 = vmatpush3.msra.mxu1 %v252_v1  ;;  %v23_v6 = vld [vmem:[%s835_s0 + $0x20] sm:$0xff]  ;;  %v28_v11 = vld [vmem:[%s835_s0 + $0x48] sm:$0xff]  ;;  %v29_v12 = vld [vmem:[%s835_s0 + $0x50] sm:$0xff] }
   0x5   :  { %523 = vmatprep.mubr.msk.f32.mxu1 %vm41_vm0, %v19_v2  ;;  %498 = vmatmul.mubr.msk.f32.vlgmr.msra.gmra.mxu0 %vm41_vm0, %v20_v3  ;;  %v27_v10 = vld [vmem:[%s835_s0 + $0x40] sm:$0xff]  ;;  %v30_v13 = vld [vmem:[%s835_s0 + $0x58] sm:$0xff]  ;;  %v32_v15 = vld [vmem:[%s835_s0 + $0x68] sm:$0xff] }
   0x6   :  { %524 = vmatmul.mubr.msk.f32.vlgmr.msra.gmra.mxu1 %vm41_vm0, %v20_v3  ;;  %500 = vmatprep.mubr.msk.f32.mxu0 %vm41_vm0, %v21_v4  ;;  %v31_v14 = vld [vmem:[%s835_s0 + $0x60] sm:$0xff]  ;;  %v33_v16 = vld [vmem:[%s835_s0 + $0x70] sm:$0xff]  ;;  %v34_v17 = vld [vmem:[%s835_s0 + $0x78] sm:$0xff] }
   0x7   :  { %526 = vmatprep.mubr.msk.f32.mxu1 %vm41_vm0, %v21_v4  ;;  %v666_v18 = vld [vmem:[%s836_s3] ss:$0 sm:$0xff]  ;;  %v671_v19 = vld [vmem:[%s836_s3 + $0x1] ss:$0 sm:$0xff] }
   0x9   :  { %501 = vmatmul.mubr.msk.f32.gmra.mxu0 %vm41_vm0, %v22_v5 }
   0xa   :  { %527 = vmatmul.mubr.msk.f32.gmra.mxu1 %vm41_vm0, %v22_v5  ;;  %503 = vmatprep.mubr.msk.f32.mxu0 %vm41_vm0, %v23_v6 }
   0xb   :  { %529 = vmatprep.mubr.msk.f32.mxu1 %vm41_vm0, %v23_v6 }
   0xd   :  { %504 = vmatmul.mubr.msk.f32.gmra.mxu0 %vm41_vm0, %v24_v7 }
   0xe   :  { %530 = vmatmul.mubr.msk.f32.gmra.mxu1 %vm41_vm0, %v24_v7  ;;  %506 = vmatprep.mubr.msk.f32.mxu0 %vm41_vm0, %v25_v8 }
   0xf   :  { %532 = vmatprep.mubr.msk.f32.mxu1 %vm41_vm0, %v25_v8 }
  0x11   :  { %507 = vmatmul.mubr.msk.f32.gmra.mxu0 %vm41_vm0, %v26_v9 }
  0x12   :  { %533 = vmatmul.mubr.msk.f32.gmra.mxu1 %vm41_vm0, %v26_v9  ;;  %509 = vmatprep.mubr.msk.f32.mxu0 %vm41_vm0, %v27_v10 }
  0x13   :  { %535 = vmatprep.mubr.msk.f32.mxu1 %vm41_vm0, %v27_v10 }
  0x15   :  { %510 = vmatmul.mubr.msk.f32.gmra.mxu0 %vm41_vm0, %v28_v11 }
  0x16   :  { %536 = vmatmul.mubr.msk.f32.gmra.mxu1 %vm41_vm0, %v28_v11  ;;  %512 = vmatprep.mubr.msk.f32.mxu0 %vm41_vm0, %v29_v12 }
  0x17   :  { %538 = vmatprep.mubr.msk.f32.mxu1 %vm41_vm0, %v29_v12 }
  0x19   :  { %513 = vmatmul.mubr.msk.f32.gmra.mxu0 %vm41_vm0, %v30_v13 }
  0x1a   :  { %539 = vmatmul.mubr.msk.f32.gmra.mxu1 %vm41_vm0, %v30_v13  ;;  %515 = vmatprep.mubr.msk.f32.mxu0 %vm41_vm0, %v31_v14 }
  0x1b   :  { %541 = vmatprep.mubr.msk.f32.mxu1 %vm41_vm0, %v31_v14 }
  0x1d   :  { %516 = vmatmul.mubr.msk.f32.gmra.mxu0 %vm41_vm0, %v32_v15 }
  0x1e   :  { %542 = vmatmul.mubr.msk.f32.gmra.mxu1 %vm41_vm0, %v32_v15  ;;  %518 = vmatprep.mubr.msk.f32.mxu0 %vm41_vm0, %v33_v16 }
  0x1f   :  { %544 = vmatprep.mubr.msk.f32.mxu1 %vm41_vm0, %v33_v16 }
  0x21   :  { %519 = vmatmul.mubr.msk.f32.gmra.mxu0 %vm41_vm0, %v34_v17 }
  0x22   :  { %545 = vmatmul.mubr.msk.f32.gmra.mxu1 %vm41_vm0, %v34_v17 }
  0xc5   :  { %v499_v20 = vpop.f32.mrf.mxu0 }
  0xc6   :  { %v525_v21 = vpop.f32.mrf.mxu1  ;;  %v162_v22 = vadd.f32 %v499_v20, %v666_v18 }
  0xc7   :  { %v330_v23 = vadd.f32 %v525_v21, %v671_v19  ;;  %v156_v24 = vpop.f32.mrf.mxu0 }
  0xc8   :  { %v324_v25 = vpop.f32.mrf.mxu1  ;;  %237 = vst.msk [vmem:[%s837_s4 + $0x8] sm:$0xff] %vm235_vm1, %v162_v22  ;;  %v157_v26 = vadd.f32 %v666_v18, %v156_v24 }
  0xc9   :  { %404 = vst.msk [vmem:[%s838_s5 + $0x8] sm:$0xff] %vm235_vm1, %v330_v23  ;;  %v325_v27 = vadd.f32 %v671_v19, %v324_v25  ;;  %v502_v28 = vpop.f32.mrf.mxu0 }
  0xca   :  { %v528_v29 = vpop.f32.mrf.mxu1  ;;  %236 = vst.msk [vmem:[%s837_s4] sm:$0xff] %vm235_vm1, %v157_v26  ;;  %v172_v30 = vadd.f32 %v502_v28, %v666_v18 }
  0xcb   :  { %403 = vst.msk [vmem:[%s838_s5] sm:$0xff] %vm235_vm1, %v325_v27  ;;  %v340_v31 = vadd.f32 %v528_v29, %v671_v19  ;;  %v166_v32 = vpop.f32.mrf.mxu0 }
  0xcc   :  { %v334_v33 = vpop.f32.mrf.mxu1  ;;  %239 = vst.msk [vmem:[%s837_s4 + $0x18] sm:$0xff] %vm235_vm1, %v172_v30  ;;  %v167_v34 = vadd.f32 %v666_v18, %v166_v32 }
  0xcd   :  { %406 = vst.msk [vmem:[%s838_s5 + $0x18] sm:$0xff] %vm235_vm1, %v340_v31  ;;  %v335_v35 = vadd.f32 %v671_v19, %v334_v33  ;;  %v505_v36 = vpop.f32.mrf.mxu0 }
  0xce   :  { %v531_v37 = vpop.f32.mrf.mxu1  ;;  %238 = vst.msk [vmem:[%s837_s4 + $0x10] sm:$0xff] %vm235_vm1, %v167_v34  ;;  %v182_v38 = vadd.f32 %v505_v36, %v666_v18 }
  0xcf   :  { %405 = vst.msk [vmem:[%s838_s5 + $0x10] sm:$0xff] %vm235_vm1, %v335_v35  ;;  %v350_v39 = vadd.f32 %v531_v37, %v671_v19  ;;  %v176_v40 = vpop.f32.mrf.mxu0 }
  0xd0   :  { %v344_v41 = vpop.f32.mrf.mxu1  ;;  %241 = vst.msk [vmem:[%s837_s4 + $0x28] sm:$0xff] %vm235_vm1, %v182_v38  ;;  %v177_v42 = vadd.f32 %v666_v18, %v176_v40 }
  0xd1   :  { %408 = vst.msk [vmem:[%s838_s5 + $0x28] sm:$0xff] %vm235_vm1, %v350_v39  ;;  %v345_v43 = vadd.f32 %v671_v19, %v344_v41  ;;  %v508_v44 = vpop.f32.mrf.mxu0 }
  0xd2   :  { %v534_v45 = vpop.f32.mrf.mxu1  ;;  %240 = vst.msk [vmem:[%s837_s4 + $0x20] sm:$0xff] %vm235_vm1, %v177_v42  ;;  %v192_v46 = vadd.f32 %v508_v44, %v666_v18 }
  0xd3   :  { %407 = vst.msk [vmem:[%s838_s5 + $0x20] sm:$0xff] %vm235_vm1, %v345_v43  ;;  %v360_v47 = vadd.f32 %v534_v45, %v671_v19  ;;  %v186_v48 = vpop.f32.mrf.mxu0 }
  0xd4   :  { %v354_v49 = vpop.f32.mrf.mxu1  ;;  %243 = vst.msk [vmem:[%s837_s4 + $0x38] sm:$0xff] %vm235_vm1, %v192_v46  ;;  %v187_v50 = vadd.f32 %v666_v18, %v186_v48 }
  0xd5   :  { %410 = vst.msk [vmem:[%s838_s5 + $0x38] sm:$0xff] %vm235_vm1, %v360_v47  ;;  %v355_v51 = vadd.f32 %v671_v19, %v354_v49  ;;  %v511_v52 = vpop.f32.mrf.mxu0 }
  0xd6   :  { %v537_v53 = vpop.f32.mrf.mxu1  ;;  %242 = vst.msk [vmem:[%s837_s4 + $0x30] sm:$0xff] %vm235_vm1, %v187_v50  ;;  %v202_v54 = vadd.f32 %v511_v52, %v666_v18 }
  0xd7   :  { %409 = vst.msk [vmem:[%s838_s5 + $0x30] sm:$0xff] %vm235_vm1, %v355_v51  ;;  %v370_v55 = vadd.f32 %v537_v53, %v671_v19  ;;  %v196_v56 = vpop.f32.mrf.mxu0 }
  0xd8   :  { %v364_v57 = vpop.f32.mrf.mxu1  ;;  %245 = vst.msk [vmem:[%s837_s4 + $0x48] sm:$0xff] %vm235_vm1, %v202_v54  ;;  %v197_v58 = vadd.f32 %v666_v18, %v196_v56 }
  0xd9   :  { %412 = vst.msk [vmem:[%s838_s5 + $0x48] sm:$0xff] %vm235_vm1, %v370_v55  ;;  %v365_v59 = vadd.f32 %v671_v19, %v364_v57  ;;  %v514_v60 = vpop.f32.mrf.mxu0 }
  0xda   :  { %v540_v61 = vpop.f32.mrf.mxu1  ;;  %244 = vst.msk [vmem:[%s837_s4 + $0x40] sm:$0xff] %vm235_vm1, %v197_v58  ;;  %v212_v62 = vadd.f32 %v514_v60, %v666_v18 }
  0xdb   :  { %411 = vst.msk [vmem:[%s838_s5 + $0x40] sm:$0xff] %vm235_vm1, %v365_v59  ;;  %v380_v63 = vadd.f32 %v540_v61, %v671_v19  ;;  %v206_v0 = vpop.f32.mrf.mxu0 }
  0xdc   :  { %v374_v1 = vpop.f32.mrf.mxu1  ;;  %247 = vst.msk [vmem:[%s837_s4 + $0x58] sm:$0xff] %vm235_vm1, %v212_v62  ;;  %v207_v2 = vadd.f32 %v666_v18, %v206_v0 }
  0xdd   :  { %414 = vst.msk [vmem:[%s838_s5 + $0x58] sm:$0xff] %vm235_vm1, %v380_v63  ;;  %v375_v3 = vadd.f32 %v671_v19, %v374_v1  ;;  %v517_v4 = vpop.f32.mrf.mxu0 }
  0xde   :  { %v543_v5 = vpop.f32.mrf.mxu1  ;;  %246 = vst.msk [vmem:[%s837_s4 + $0x50] sm:$0xff] %vm235_vm1, %v207_v2  ;;  %v222_v6 = vadd.f32 %v517_v4, %v666_v18 }
  0xdf   :  { %413 = vst.msk [vmem:[%s838_s5 + $0x50] sm:$0xff] %vm235_vm1, %v375_v3  ;;  %v390_v7 = vadd.f32 %v543_v5, %v671_v19  ;;  %v216_v8 = vpop.f32.mrf.mxu0 }
  0xe0   :  { %v384_v9 = vpop.f32.mrf.mxu1  ;;  %249 = vst.msk [vmem:[%s837_s4 + $0x68] sm:$0xff] %vm235_vm1, %v222_v6  ;;  %v217_v10 = vadd.f32 %v666_v18, %v216_v8 }
  0xe1   :  { %416 = vst.msk [vmem:[%s838_s5 + $0x68] sm:$0xff] %vm235_vm1, %v390_v7  ;;  %v385_v11 = vadd.f32 %v671_v19, %v384_v9  ;;  %v520_v12 = vpop.f32.mrf.mxu0 }
  0xe2   :  { %v546_v13 = vpop.f32.mrf.mxu1  ;;  %248 = vst.msk [vmem:[%s837_s4 + $0x60] sm:$0xff] %vm235_vm1, %v217_v10  ;;  %v232_v14 = vadd.f32 %v520_v12, %v666_v18 }
  0xe3   :  { %415 = vst.msk [vmem:[%s838_s5 + $0x60] sm:$0xff] %vm235_vm1, %v385_v11  ;;  %v400_v15 = vadd.f32 %v546_v13, %v671_v19  ;;  %v226_v16 = vpop.f32.mrf.mxu0 }
  0xe4   :  { %v394_v17 = vpop.f32.mrf.mxu1  ;;  %251 = vst.msk [vmem:[%s837_s4 + $0x78] sm:$0xff] %vm235_vm1, %v232_v14  ;;  %v227_v20 = vadd.f32 %v666_v18, %v226_v16 }
  0xe5   :  { %418 = vst.msk [vmem:[%s838_s5 + $0x78] sm:$0xff] %vm235_vm1, %v400_v15  ;;  %v395_v21 = vadd.f32 %v671_v19, %v394_v17 }
  0xe6   :  { %250 = vst.msk [vmem:[%s837_s4 + $0x70] sm:$0xff] %vm235_vm1, %v227_v20 }
  0xe7   :  { %417 = vst.msk [vmem:[%s838_s5 + $0x70] sm:$0xff] %vm235_vm1, %v395_v21 }

</bundles_post_ra>
